<compile_context>
chip_gen: v5e
topology: v5e:2x2
jax: 0.10.0
libtpu: 0.0.40
codegen_flags: <defaults>
</compile_context>

<pallas_src>
import jax
import jax.numpy as jnp
from jax.experimental import pallas as pl
from jax.experimental.pallas import tpu as pltpu

FILTERS = 32          # `filters`
KS = 5                # `ks`
CAPS = 4              # `primary_capslen`
STRIDE = 2            # `stride`
FC = FILTERS * CAPS   # 128 fused output rows (filter-major, capsule-minor)


def _convcaps_kernel(p_ref, w_ref, g_ref, out_ref):
    # p_ref:   (KS+1, TN) bf16   im2col patches (+ ones row), N=B*O on lanes
    # w_ref:   (FC, KS+1) bf16   fused conv weights (+ bias column), resident
    # g_ref:   (FC, FC)   f32    block-diagonal 4x4 ones, resident
    # out_ref: (FC, TN)   f32    squashed capsule slab (lane-dense)
    y = jnp.dot(w_ref[...], p_ref[...],
                preferred_element_type=jnp.float32)          # conv + bias, (FC, TN)
    norm = jnp.dot(g_ref[...], y * y,
                   preferred_element_type=jnp.float32)       # per-group ||.||^2, bcast
    inv = pl.reciprocal(1.0 + norm, approx=True)             # EUP slot
    out_ref[...] = y * jnp.sqrt(norm) * inv                  # squash (0 at norm==0)


def _round_up(a, b):
    return (a + b - 1) // b * b


def conv_caps_2d(x, weights, bias, *, lane_tile=4096):
    """x: (B, L) f32; weights: (FILTERS, CAPS, KS); bias: (FILTERS, CAPS).

    Returns (B, FILTERS*O, CAPS) with O = (L - KS)//STRIDE + 1, matching
    torch.cat([...], dim=2).permute(0, 2, 1) followed by squash(dim=-1)."""
    B, L = x.shape
    O = (L - KS) // STRIDE + 1
    n = B * O

    # im2col without gather/transpose: KS strided slices stacked (KS, B, O),
    # then a free reshape to (KS, B*O); append a row of ones so the bias is
    # folded into the conv matmul (K: 5 -> 6, free inside the 8-sublane pad).
    cols = [x[:, k:k + (O - 1) * STRIDE + 1:STRIDE] for k in range(KS)]   # (B, O) each
    patches_t = jnp.stack(cols, axis=0).reshape(KS, n)                    # (KS, n)
    patches_t = jnp.concatenate(
        [patches_t, jnp.ones((1, n), patches_t.dtype)], axis=0)          # (KS+1, n)

    # Pad the big axis to a lane-aligned tile multiple (padded columns are
    # all-zero, produce 0 output, and are sliced off afterwards).
    tn = lane_tile if n >= lane_tile else _round_up(n, 128)
    n_pad = _round_up(n, tn)
    patches_t = jnp.pad(patches_t, ((0, 0), (0, n_pad - n))).astype(jnp.bfloat16)

    # Fused filter-major weight slab with the bias folded in as column KS.
    w_fused = jnp.concatenate(
        [weights.astype(jnp.float32), bias.astype(jnp.float32)[..., None]],
        axis=-1).reshape(FC, KS + 1).astype(jnp.bfloat16)                 # (FC, 6)

    # (FC, FC) block-diagonal of 4x4 ones -> group-of-4 row sums on the MXU
    # (0/1 entries; also broadcasts each group's norm to its 4 rows).
    gsum = jnp.kron(jnp.eye(FILTERS, dtype=jnp.float32),
                    jnp.ones((CAPS, CAPS), jnp.float32))                  # (128, 128)

    slab = pl.pallas_call(
        _convcaps_kernel,
        out_shape=jax.ShapeDtypeStruct((FC, n_pad), jnp.float32),
        grid=(n_pad // tn,),
        in_specs=[
            pl.BlockSpec((KS + 1, tn), lambda i: (0, i)),   # streamed patch tiles
            pl.BlockSpec((FC, KS + 1), lambda i: (0, 0)),   # resident fused weights
            pl.BlockSpec((FC, FC), lambda i: (0, 0)),       # resident G
        ],
        out_specs=pl.BlockSpec((FC, tn), lambda i: (0, i)),
        compiler_params=pltpu.CompilerParams(
            dimension_semantics=("parallel",),
            vmem_limit_bytes=32 * 1024 * 1024),
    )(patches_t, w_fused, gsum)

    # (FC, n) -> (B, FILTERS*O, CAPS) in filter-major concat order (= torch.cat).
    # TODO(synk): this permutation is one extra XLA pass over the largest tensor;
    # fold it into the downstream consumer (and/or emit the slab in bf16) if the
    # kernel is writeback-bound at production sizes.
    out = slab[:, :n].reshape(FILTERS, CAPS, B, O).transpose(2, 0, 3, 1)
    return out.reshape(B, FILTERS * O, CAPS)


def _reference(x, weights, bias):
    """Pure-JAX f32 reference mirroring the PyTorch forward."""
    B, L = x.shape
    O = (L - KS) // STRIDE + 1
    idx = jnp.arange(O)[:, None] * STRIDE + jnp.arange(KS)[None, :]
    patches = x[:, idx]                                                  # (B, O, KS)
    y = jnp.einsum("bok,fck->bfoc", patches, weights) + bias[None, :, None, :]
    y = y.reshape(B, FILTERS * O, CAPS)
    norm = jnp.sum(y * y, axis=-1, keepdims=True)
    scale = norm / (1.0 + norm)
    return scale * y / jnp.sqrt(norm)


if __name__ == "__main__":
    key = jax.random.PRNGKey(0)
    kx, kw, kb = jax.random.split(key, 3)

    B, L = 2, 16                                   # x: (B, L) sequence input
    x = jax.random.normal(kx, (B, L), dtype=jnp.float32)

    # Parameter shapes from nn.Conv2d(1, 4, (5,1), stride=2): weight
    # (CAPS, 1, KS, 1) per capsule -> packed as (FILTERS, CAPS, KS);
    # PyTorch default init is U(-1/sqrt(fan_in), 1/sqrt(fan_in)), fan_in = KS.
    bound = 1.0 / (KS ** 0.5)
    weights = jax.random.uniform(kw, (FILTERS, CAPS, KS), jnp.float32,
                                 minval=-bound, maxval=bound)
    bias = jax.random.uniform(kb, (FILTERS, CAPS), jnp.float32,
                              minval=-bound, maxval=bound)

    out = conv_caps_2d(x, weights, bias)
    out = jax.block_until_ready(out)

    O = (L - KS) // STRIDE + 1
    assert out.shape == (B, FILTERS * O, CAPS), out.shape
    assert bool(jnp.all(jnp.isfinite(out)))

    ref = _reference(x, weights, bias)
    # Tolerance accounts for bf16 conv operands (f32 accumulate) and the EUP
    # approximate reciprocal; squash outputs have magnitude <= 1.
    assert jnp.allclose(out, ref, atol=2e-2, rtol=2e-2), \
        float(jnp.max(jnp.abs(out - ref)))

    print("KERNEL_OK")
</pallas_src>

<mosaic_0001>
module attributes {stable_mosaic.version = 11 : i64} {
  func.func @_convcaps_kernel(%arg0: i32, %arg1: memref<6x128xbf16, #tpu.memory_space<vmem>>, %arg2: memref<128x6xbf16, #tpu.memory_space<vmem>>, %arg3: memref<128x128xf32, #tpu.memory_space<vmem>>, %arg4: memref<128x128xf32, #tpu.memory_space<vmem>>) attributes {dimension_semantics = [#tpu.dimension_semantics<parallel>], iteration_bounds = array<i64: 1>, scalar_prefetch = 0 : i64, scratch_operands = 0 : i64, tpu.core_type = #tpu.core_type<tc>, window_params = [{transform_indices = @transform_0, window_bounds = array<i64: 6, 128>}, {pipeline_mode = #tpu.pipeline_mode<synchronous>, transform_indices = @transform_1, window_bounds = array<i64: 128, 6>}, {pipeline_mode = #tpu.pipeline_mode<synchronous>, transform_indices = @transform_2, window_bounds = array<i64: 128, 128>}, {transform_indices = @transform_3, window_bounds = array<i64: 128, 128>}]} {
    %c0 = arith.constant 0 : index
    %c0_0 = arith.constant 0 : index
    %0 = vector.load %arg2[%c0, %c0_0] : memref<128x6xbf16, #tpu.memory_space<vmem>>, vector<128x6xbf16>
    %c0_1 = arith.constant 0 : index
    %c0_2 = arith.constant 0 : index
    %1 = vector.load %arg1[%c0_1, %c0_2] : memref<6x128xbf16, #tpu.memory_space<vmem>>, vector<6x128xbf16>
    %cst = arith.constant dense<0.000000e+00> : vector<128x128xf32>
    %2 = tpu.matmul %0, %1, %cst {dimension_numbers = #tpu.dot_dimension_numbers<[1], [0], [0], [1], [0, 0, 1, 1], [], []>} : vector<128x6xbf16>, vector<6x128xbf16>, vector<128x128xf32> -> vector<128x128xf32>
    %c0_3 = arith.constant 0 : index
    %c0_4 = arith.constant 0 : index
    %3 = vector.load %arg3[%c0_3, %c0_4] : memref<128x128xf32, #tpu.memory_space<vmem>>, vector<128x128xf32>
    %4 = arith.mulf %2, %2 : vector<128x128xf32>
    %cst_5 = arith.constant dense<0.000000e+00> : vector<128x128xf32>
    %5 = tpu.matmul %3, %4, %cst_5 {dimension_numbers = #tpu.dot_dimension_numbers<[1], [0], [0], [1], [0, 0, 1, 1], [], []>} : vector<128x128xf32>, vector<128x128xf32>, vector<128x128xf32> -> vector<128x128xf32>
    %cst_6 = arith.constant 1.000000e+00 : f32
    %6 = vector.broadcast %cst_6 : f32 to vector<128x128xf32>
    %7 = arith.addf %6, %5 : vector<128x128xf32>
    %8 = tpu.reciprocal %7 {approx = true} : vector<128x128xf32> -> vector<128x128xf32>
    %9 = math.sqrt %5 : vector<128x128xf32>
    %10 = arith.mulf %2, %9 : vector<128x128xf32>
    %11 = arith.mulf %10, %8 : vector<128x128xf32>
    %c0_7 = arith.constant 0 : index
    %c0_8 = arith.constant 0 : index
    %12 = vector.load %arg4[%c0_7, %c0_8] : memref<128x128xf32, #tpu.memory_space<vmem>>, vector<128x128xf32>
    tpu.vector_store %arg4[%c0_7, %c0_8], %11 {strides = array<i32>} : memref<128x128xf32, #tpu.memory_space<vmem>>, vector<128x128xf32>,
    return
  }
  func.func @transform_0(%arg0: i32) -> (i32, i32) {
    %c0_i32 = arith.constant 0 : i32
    %c0_i32_0 = arith.constant 0 : i32
    return %c0_i32, %arg0 : i32, i32
  }
  func.func @transform_1(%arg0: i32) -> (i32, i32) {
    %c0_i32 = arith.constant 0 : i32
    %c0_i32_0 = arith.constant 0 : i32
    %c0_i32_1 = arith.constant 0 : i32
    return %c0_i32, %c0_i32_0 : i32, i32
  }
  func.func @transform_2(%arg0: i32) -> (i32, i32) {
    %c0_i32 = arith.constant 0 : i32
    %c0_i32_0 = arith.constant 0 : i32
    %c0_i32_1 = arith.constant 0 : i32
    return %c0_i32, %c0_i32_0 : i32, i32
  }
  func.func @transform_3(%arg0: i32) -> (i32, i32) {
    %c0_i32 = arith.constant 0 : i32
    %c0_i32_0 = arith.constant 0 : i32
    return %c0_i32, %arg0 : i32, i32
  }
}

</mosaic_0001>

<bundles_post_ra>
// kernel: tpu_custom_call.1
= control target key start
LH: loop header
LB: loop body
LE: loop exit
PB: predicated region body
PF: predicated region fallthrough
CT: control target
= control target key end

     0   :  { %8 = vsyncpa [#allocation3], 0  ;;  %s1083_s0 = inlined_call_operand.vmem [shape: bf16[6,128], index: 0, kind: input, shape index: {}]   ;;  %s1084_s1 = inlined_call_operand.vmem [shape: bf16[128,6], index: 1, kind: input, shape index: {}]   ;;  %s1085_s2 = inlined_call_operand.hbm [shape: f32[128,128], index: 2, kind: input, shape index: {}]   ;;  %s1086_s3 = inlined_call_operand.hbm [shape: f32[128,128], index: 3, kind: output, shape index: {}]  }
   0x1   :  { %9 = vsyncpa [#allocation4], 0  ;;  %s18_s14 = sshll.u32 %s1085_s2, 4  ;;  %s756_s15 = smov [#allocation2]   ;;  %s19_s14 = int_to_ptr.hbm [resolvable:$true] %s18_s14 }
   0x2   :  { %s20_s16 = sshll.u32 %s756_s15, 4  ;;  %s757_s17 = smov 128   ;;  %s21_s16 = int_to_ptr.vmem [resolvable:$true] %s20_s16 }
   0x3   :  { %s758_s18 = smov 8  }
   0x4   :  { %26 = dma.hbm_to_vmem [thread:$0]  %s19_s14, 2048, %s21_s16, [#allocation3], %s757_s17, %s757_s17, %s758_s18  }
   0x5   :  { %752 = dma.done.wait [#allocation3], 2048  }
   0x6   :  { %753 = vsyncadd [#allocation3], 4294965248  ;;  %vm114_vm0 = vcmask 1042432   ;;  %v48_v0 = vld [vmem:[%s1083_s0] sm:$0x7]  ;;  %v600_v3 = vld [vmem:[%s1084_s1 + $0x28] sm:$0xff] }
   0x7   :  { %v116_v1 = vsel %vm114_vm0, %v48_v0, 0  ;;  %v595_v2 = vld [vmem:[%s1084_s1] sm:$0xff]  ;;  %vm89_vm1 = vcmask 48128   ;;  %v596_v4 = vld [vmem:[%s1084_s1 + $0x8] sm:$0xff]  ;;  %v601_v5 = vld [vmem:[%s1084_s1 + $0x30] sm:$0xff]  ;;  %s542_s11 = sshll.u32 %s1086_s3, 4  ;;  %s543_s11 = int_to_ptr.hbm [resolvable:$true] %s542_s11 }
   0x8   :  { %125 = vmatpush.bf16.msra.mxu0 %v116_v1  ;;  %603 = vmatpush.bf16.msra.mxu3 %v116_v1  ;;  %v597_v6 = vld [vmem:[%s1084_s1 + $0x10] sm:$0xff]  ;;  %v602_v7 = vld [vmem:[%s1084_s1 + $0x38] sm:$0xff]  ;;  %v599_v9 = vld [vmem:[%s1084_s1 + $0x20] sm:$0xff] }
   0x9   :  { %v598_v8 = vld [vmem:[%s1084_s1 + $0x18] sm:$0xff]  ;;  %v167_v42 = vld [vmem:[#allocation2] sm:$0xff]  ;;  %v181_v44 = vld [vmem:[#allocation2 + $0x70] sm:$0xff]  ;;  %s759_s1 = smov [#allocation5]  }
   0xa   :  { %v174_v43 = vld [vmem:[#allocation2 + $0x38] sm:$0xff]  ;;  %v168_v45 = vld [vmem:[#allocation2 + $0x8] sm:$0xff]  ;;  %v175_v46 = vld [vmem:[#allocation2 + $0x40] sm:$0xff]  ;;  %s540_s8 = sshll.u32 %s759_s1, 4  ;;  %s541_s8 = int_to_ptr.vmem [resolvable:$true] %s540_s8 }
   0xb   :  { %587 = vmatmul.msk.bf16.vlgmr.msra.gmra.mxu0 %vm89_vm1, %v595_v2  ;;  %592 = vmatmul.msk.bf16.vlgmr.msra.gmra.mxu3 %vm89_vm1, %v600_v3  ;;  %v182_v47 = vld [vmem:[#allocation2 + $0x78] sm:$0xff]  ;;  %v169_v48 = vld [vmem:[#allocation2 + $0x10] sm:$0xff]  ;;  %v176_v49 = vld [vmem:[#allocation2 + $0x48] sm:$0xff] }
   0xc   :  { %v170_v50 = vld [vmem:[#allocation2 + $0x18] sm:$0xff]  ;;  %v177_v51 = vld [vmem:[#allocation2 + $0x50] sm:$0xff]  ;;  %v171_v52 = vld [vmem:[#allocation2 + $0x20] sm:$0xff] }
   0xd   :  { %v178_v53 = vld [vmem:[#allocation2 + $0x58] sm:$0xff]  ;;  %v172_v54 = vld [vmem:[#allocation2 + $0x28] sm:$0xff]  ;;  %v179_v55 = vld [vmem:[#allocation2 + $0x60] sm:$0xff] }
   0xe   :  { %v173_v56 = vld [vmem:[#allocation2 + $0x30] sm:$0xff]  ;;  %v180_v57 = vld [vmem:[#allocation2 + $0x68] sm:$0xff] }
  0x1b   :  { %588 = vmatmul.msk.bf16.gmra.mxu0 %vm89_vm1, %v596_v4  ;;  %593 = vmatmul.msk.bf16.gmra.mxu3 %vm89_vm1, %v601_v5 }
  0x2b   :  { %589 = vmatmul.msk.bf16.gmra.mxu0 %vm89_vm1, %v597_v6  ;;  %594 = vmatmul.msk.bf16.gmra.mxu3 %vm89_vm1, %v602_v7 }
  0x3b   :  { %590 = vmatmul.msk.bf16.gmra.mxu0 %vm89_vm1, %v598_v8 }
  0x4b   :  { %591 = vmatmul.msk.bf16.gmra.mxu0 %vm89_vm1, %v599_v9 }
  0x88   :  { %v813_v10 = vpop.f32.mrf.mxu0 }
  0x89   :  { %v183_v41 = vmul.f32 %v813_v10, %v813_v10 }
  0x8e   :  { %v815_v11 = vpop.f32.mrf.mxu3 }
  0x8f   :  { %v193_v29 = vmul.f32 %v815_v11, %v815_v11 }
  0x90   :  { %v817_v12 = vpop.f32.mrf.mxu0 }
  0x91   :  { %v184_v40 = vmul.f32 %v817_v12, %v817_v12 }
  0x96   :  { %v819_v13 = vpop.f32.mrf.mxu3 }
  0x97   :  { %v194_v27 = vmul.f32 %v819_v13, %v819_v13 }
  0x98   :  { %v821_v14 = vpop.f32.mrf.mxu0 }
  0x99   :  { %v185_v39 = vmul.f32 %v821_v14, %v821_v14 }
  0x9e   :  { %v823_v15 = vpop.f32.mrf.mxu3 }
  0x9f   :  { %v195_v26 = vmul.f32 %v823_v15, %v823_v15 }
  0xa0   :  { %v825_v16 = vpop.f32.mrf.mxu0 }
  0xa1   :  { %v186_v38 = vmul.f32 %v825_v16, %v825_v16 }
  0xa6   :  { %v827_v17 = vpop.f32.mrf.mxu3 }
  0xa7   :  { %v196_v25 = vmul.f32 %v827_v17, %v827_v17 }
  0xa8   :  { %v829_v18 = vpop.f32.mrf.mxu0 }
  0xa9   :  { %v187_v37 = vmul.f32 %v829_v18, %v829_v18 }
  0xae   :  { %v831_v19 = vpop.f32.mrf.mxu3 }
  0xaf   :  { %v197_v22 = vmul.f32 %v831_v19, %v831_v19 }
  0xb0   :  { %v833_v20 = vpop.f32.mrf.mxu0 }
  0xb1   :  { %v188_v36 = vmul.f32 %v833_v20, %v833_v20 }
  0xb6   :  { %v835_v21 = vpop.f32.mrf.mxu3 }
  0xb7   :  { %v198_v23 = vmul.f32 %v835_v21, %v835_v21 }
  0xb8   :  { %v841_v24 = vpop.f32.mrf.mxu0 }
  0xb9   :  { %199 = vmatpush.msra.mxu1 %v198_v23  ;;  %604 = vmatpush.msra.mxu2 %v198_v23  ;;  %v189_v35 = vmul.f32 %v841_v24, %v841_v24 }
  0xba   :  { %605 = vmatpush.msrb.mxu3 %v198_v23 }
  0xbb   :  { %200 = vmatpush.msra.mxu1 %v197_v22  ;;  %606 = vmatpush.msra.mxu2 %v197_v22 }
  0xbc   :  { %607 = vmatpush.msrb.mxu3 %v197_v22 }
  0xbd   :  { %201 = vmatpush.msra.mxu1 %v196_v25  ;;  %608 = vmatpush.msra.mxu2 %v196_v25 }
  0xbe   :  { %609 = vmatpush.msrb.mxu3 %v196_v25 }
  0xbf   :  { %202 = vmatpush.msra.mxu1 %v195_v26  ;;  %610 = vmatpush.msra.mxu2 %v195_v26 }
  0xc0   :  { %611 = vmatpush.msrb.mxu3 %v195_v26  ;;  %v849_v28 = vpop.f32.mrf.mxu0 }
  0xc1   :  { %203 = vmatpush.msra.mxu1 %v194_v27  ;;  %612 = vmatpush.msra.mxu2 %v194_v27  ;;  %v190_v34 = vmul.f32 %v849_v28, %v849_v28 }
  0xc2   :  { %613 = vmatpush.msrb.mxu3 %v194_v27 }
  0xc3   :  { %204 = vmatpush.msra.mxu1 %v193_v29  ;;  %614 = vmatpush.msra.mxu2 %v193_v29 }
  0xc4   :  { %615 = vmatpush.msrb.mxu3 %v193_v29 }
  0xc8   :  { %v853_v30 = vpop.f32.mrf.mxu0 }
  0xc9   :  { %v191_v33 = vmul.f32 %v853_v30, %v853_v30 }
  0xd0   :  { %v855_v31 = vpop.f32.mrf.mxu0 }
  0xd1   :  { %v192_v32 = vmul.f32 %v855_v31, %v855_v31 }
  0xd3   :  { %205 = vmatpush.msra.mxu1 %v192_v32  ;;  %616 = vmatpush.msra.mxu2 %v192_v32 }
  0xd4   :  { %617 = vmatpush.msrb.mxu3 %v192_v32 }
  0xd5   :  { %206 = vmatpush.msra.mxu1 %v191_v33  ;;  %618 = vmatpush.msra.mxu2 %v191_v33 }
  0xd6   :  { %619 = vmatpush.msrb.mxu3 %v191_v33 }
  0xd7   :  { %207 = vmatpush.msra.mxu1 %v190_v34  ;;  %620 = vmatpush.msra.mxu2 %v190_v34 }
  0xd8   :  { %621 = vmatpush.msrb.mxu3 %v190_v34 }
  0xd9   :  { %208 = vmatpush.msra.mxu1 %v189_v35  ;;  %622 = vmatpush.msra.mxu2 %v189_v35 }
  0xda   :  { %623 = vmatpush.msrb.mxu3 %v189_v35 }
  0xdb   :  { %209 = vmatpush.msra.mxu1 %v188_v36  ;;  %624 = vmatpush.msra.mxu2 %v188_v36 }
  0xdc   :  { %625 = vmatpush.msrb.mxu3 %v188_v36 }
  0xdd   :  { %210 = vmatpush.msra.mxu1 %v187_v37  ;;  %626 = vmatpush.msra.mxu2 %v187_v37 }
  0xde   :  { %627 = vmatpush.msrb.mxu3 %v187_v37 }
  0xdf   :  { %211 = vmatpush.msra.mxu1 %v186_v38  ;;  %628 = vmatpush.msra.mxu2 %v186_v38 }
  0xe0   :  { %629 = vmatpush.msrb.mxu3 %v186_v38 }
  0xe1   :  { %212 = vmatpush.msra.mxu1 %v185_v39  ;;  %630 = vmatpush.msra.mxu2 %v185_v39 }
  0xe2   :  { %631 = vmatpush.msrb.mxu3 %v185_v39 }
  0xe3   :  { %213 = vmatpush.msra.mxu1 %v184_v40  ;;  %632 = vmatpush.msra.mxu2 %v184_v40 }
  0xe4   :  { %633 = vmatpush.msrb.mxu3 %v184_v40 }
  0xe5   :  { %214 = vmatpush.msra.mxu1 %v183_v41  ;;  %634 = vmatpush.msra.mxu2 %v183_v41 }
  0xe6   :  { %635 = vmatpush.msrb.mxu3 %v183_v41  ;;  %215 = vmatmul.f32.vlgmr.msra.gmra.mxu1 %v167_v42 }
  0xe7   :  { %236 = vmatmul.f32.vlgmr.msra.gmra.mxu2 %v174_v43  ;;  %257 = vmatmul.f32.vlgmr.msrb.gmra.mxu3 %v181_v44 }
  0xee   :  { %218 = vmatmul.f32.gmra.mxu1 %v168_v45 }
  0xef   :  { %239 = vmatmul.f32.gmra.mxu2 %v175_v46  ;;  %260 = vmatmul.f32.gmra.mxu3 %v182_v47 }
  0xf6   :  { %221 = vmatmul.f32.gmra.mxu1 %v169_v48 }
  0xf7   :  { %242 = vmatmul.f32.gmra.mxu2 %v176_v49 }
  0xfe   :  { %224 = vmatmul.f32.gmra.mxu1 %v170_v50 }
  0xff   :  { %245 = vmatmul.f32.gmra.mxu2 %v177_v51 }
 0x106   :  { %227 = vmatmul.f32.gmra.mxu1 %v171_v52 }
 0x107   :  { %248 = vmatmul.f32.gmra.mxu2 %v178_v53 }
 0x10e   :  { %230 = vmatmul.f32.gmra.mxu1 %v172_v54 }
 0x10f   :  { %251 = vmatmul.f32.gmra.mxu2 %v179_v55 }
 0x116   :  { %233 = vmatmul.f32.gmra.mxu1 %v173_v56 }
 0x117   :  { %254 = vmatmul.f32.gmra.mxu2 %v180_v57 }
 0x163   :  { %v216_v58 = vpop.f32.mrf.mxu1 }
 0x164   :  { %640 = vrsqrt.f32 %v216_v58  ;;  %v264_v2 = vadd.f32 1.0, %v216_v58  ;;  %vm303_vm2 = vcmp.eq.f32.partialorder %v216_v58, inf  ;;  %vm305_vm3 = vcmp.eq.f32.partialorder %v216_v58, 0.0 }
 0x165   :  { %v306_v27 = vand.u32 2147483648, %v216_v58 }
 0x16a   :  { %v641_v59 = vpop.eup %640  ;;  %v877_v60 = vpop.f32.mrf.mxu2 }
 0x16b   :  { %v879_v61 = vpop.f32.mrf.mxu3  ;;  %v297_v62 = vmul.f32 %v641_v59, %v216_v58  ;;  %642 = vrsqrt.f32 %v877_v60  ;;  %v882_v63 = vpop.f32.mrf.mxu1  ;;  %v271_v5 = vadd.f32 1.0, %v877_v60  ;;  %v390_v32 = vand.u32 2147483648, %v877_v60 }
 0x16c   :  { %644 = vrsqrt.f32 %v879_v61  ;;  %v278_v22 = vadd.f32 1.0, %v879_v61  ;;  %vm387_vm4 = vcmp.eq.f32.partialorder %v877_v60, inf  ;;  %vm471_vm5 = vcmp.eq.f32.partialorder %v879_v61, inf }
 0x16d   :  { %v298_v0 = vmul.f32 %v641_v59, %v297_v62  ;;  %646 = vrsqrt.f32 %v882_v63  ;;  %vm389_vm6 = vcmp.eq.f32.partialorder %v877_v60, 0.0  ;;  %vm473_vm7 = vcmp.eq.f32.partialorder %v879_v61, 0.0 }
 0x16e   :  { %v265_v40 = vadd.f32 1.0, %v882_v63  ;;  %v474_v43 = vand.u32 2147483648, %v879_v61  ;;  %vm315_vm8 = vcmp.eq.f32.partialorder %v882_v63, inf  ;;  %vm317_vm9 = vcmp.eq.f32.partialorder %v882_v63, 0.0 }
 0x16f   :  { %v299_v1 = vmul.f32 0.5, %v298_v0 }
 0x171   :  { %v643_v3 = vpop.eup %642  ;;  %v300_v4 = vsub.f32 1.5, %v299_v1 }
 0x172   :  { %v645_v6 = vpop.eup %644  ;;  %v381_v7 = vmul.f32 %v643_v3, %v877_v60  ;;  %v888_v8 = vpop.f32.mrf.mxu2 }
 0x173   :  { %v301_v9 = vmul.f32 %v641_v59, %v300_v4  ;;  %v465_v23 = vmul.f32 %v645_v6, %v879_v61  ;;  %648 = vrsqrt.f32 %v888_v8  ;;  %v893_v25 = vpop.f32.mrf.mxu3  ;;  %v895_v26 = vpop.f32.mrf.mxu1  ;;  %v272_v62 = vadd.f32 1.0, %v888_v8 }
 0x174   :  { %650 = vrcp.f32 %v264_v2  ;;  %v382_v29 = vmul.f32 %v643_v3, %v381_v7  ;;  %v647_v33 = vpop.eup %646  ;;  %vm399_vm10 = vcmp.eq.f32.partialorder %v888_v8, inf  ;;  %vm401_vm11 = vcmp.eq.f32.partialorder %v888_v8, 0.0 }
 0x175   :  { %v302_v34 = vmul.f32 %v301_v9, %v216_v58  ;;  %652 = vrcp.f32 %v271_v5  ;;  %v466_v35 = vmul.f32 %v645_v6, %v465_v23  ;;  %v309_v37 = vmul.f32 %v647_v33, %v882_v63 }
 0x176   :  { %v383_v36 = vmul.f32 0.5, %v382_v29  ;;  %654 = vrsqrt.f32 %v893_v25  ;;  %v402_v7 = vand.u32 2147483648, %v888_v8  ;;  %vm483_vm12 = vcmp.eq.f32.partialorder %v893_v25, inf }
 0x177   :  { %v304_v38 = vsel %vm303_vm2, %v216_v58, %v302_v34  ;;  %656 = vrcp.f32 %v278_v22  ;;  %v467_v39 = vmul.f32 0.5, %v466_v35  ;;  %v310_v44 = vmul.f32 %v647_v33, %v309_v37 }
 0x178   :  { %v307_v41 = vsel %vm305_vm3, %v306_v27, %v304_v38  ;;  %v384_v42 = vsub.f32 1.5, %v383_v36  ;;  %658 = vrsqrt.f32 %v895_v26  ;;  %v279_v27 = vadd.f32 1.0, %v893_v25 }
 0x179   :  { %v649_v45 = vpop.eup %648  ;;  %v488_v46 = vmul.f32 %v307_v41, %v813_v10  ;;  %v468_v47 = vsub.f32 1.5, %v467_v39  ;;  %v311_v50 = vmul.f32 0.5, %v310_v44  ;;  %660 = vrcp.f32 %v265_v40 }
 0x17a   :  { %v651_v48 = vpop.eup %650  ;;  %v385_v49 = vmul.f32 %v643_v3, %v384_v42  ;;  %v393_v51 = vmul.f32 %v649_v45, %v888_v8  ;;  %v913_v52 = vpop.f32.mrf.mxu2  ;;  %v318_v10 = vand.u32 2147483648, %v882_v63  ;;  %vm485_vm13 = vcmp.eq.f32.partialorder %v893_v25, 0.0 }
 0x17b   :  { %v653_v53 = vpop.eup %652  ;;  %v504_v54 = vmul.f32 %v651_v48, %v488_v46  ;;  %v469_v55 = vmul.f32 %v645_v6, %v468_v47  ;;  %v916_v56 = vpop.f32.mrf.mxu1  ;;  %v312_v59 = vsub.f32 1.5, %v311_v50  ;;  %662 = vrsqrt.f32 %v913_v52 }
 0x17c   :  { %v655_v57 = vpop.eup %654  ;;  %v386_v58 = vmul.f32 %v385_v49, %v877_v60  ;;  %v394_v0 = vmul.f32 %v649_v45, %v393_v51  ;;  %664 = vrcp.f32 %v272_v62  ;;  %v486_v50 = vand.u32 2147483648, %v893_v25 }
 0x17d   :  { %v657_v1 = vpop.eup %656  ;;  %520 = vst [vmem:[#allocation5] sm:$0xff] %v504_v54  ;;  %v470_v2 = vmul.f32 %v469_v55, %v879_v61  ;;  %v477_v3 = vmul.f32 %v655_v57, %v893_v25  ;;  %v313_v5 = vmul.f32 %v647_v33, %v312_v59  ;;  %666 = vrcp.f32 %v279_v27 }
 0x17e   :  { %v388_v4 = vsel %vm387_vm4, %v877_v60, %v386_v58  ;;  %v395_v6 = vmul.f32 0.5, %v394_v0  ;;  %v659_v9 = vpop.eup %658  ;;  %668 = vrsqrt.f32 %v916_v56  ;;  %v266_v54 = vadd.f32 1.0, %v895_v26 }
 0x17f   :  { %v391_v22 = vsel %vm389_vm6, %v390_v32, %v388_v4  ;;  %v472_v23 = vsel %vm471_vm5, %v879_v61, %v470_v2  ;;  %v478_v29 = vmul.f32 %v655_v57, %v477_v3  ;;  %v314_v35 = vmul.f32 %v313_v5, %v882_v63  ;;  %v661_v37 = vpop.eup %660 }
 0x180   :  { %v495_v34 = vmul.f32 %v391_v22, %v849_v28  ;;  %v475_v33 = vsel %vm473_vm7, %v474_v43, %v472_v23  ;;  %v396_v36 = vsub.f32 1.5, %v395_v6  ;;  %v321_v32 = vmul.f32 %v659_v9, %v895_v26 }
 0x181   :  { %v502_v38 = vmul.f32 %v475_v33, %v831_v19  ;;  %v479_v60 = vmul.f32 0.5, %v478_v29  ;;  %v316_v40 = vsel %vm315_vm8, %v882_v63, %v314_v35  ;;  %v663_v61 = vpop.eup %662  ;;  %v273_v2 = vadd.f32 1.0, %v913_v52 }
 0x182   :  { %v511_v39 = vmul.f32 %v653_v53, %v495_v34  ;;  %v397_v41 = vmul.f32 %v649_v45, %v396_v36  ;;  %v945_v28 = vpop.f32.mrf.mxu2  ;;  %v319_v43 = vsel %vm317_vm9, %v318_v10, %v316_v40  ;;  %v322_v44 = vmul.f32 %v659_v9, %v321_v32  ;;  %v665_v55 = vpop.eup %664 }
 0x183   :  { %v518_v42 = vmul.f32 %v657_v1, %v502_v38  ;;  %v480_v19 = vsub.f32 1.5, %v479_v60  ;;  %v949_v46 = vpop.f32.mrf.mxu1  ;;  %v489_v47 = vmul.f32 %v319_v43, %v817_v12  ;;  %v405_v45 = vmul.f32 %v663_v61, %v913_v52 }
 0x184   :  { %527 = vst [vmem:[#allocation5 + $0x38] sm:$0xff] %v511_v39  ;;  %v398_v48 = vmul.f32 %v397_v41, %v888_v8  ;;  %v323_v51 = vmul.f32 0.5, %v322_v44  ;;  %670 = vrsqrt.f32 %v945_v28  ;;  %vm327_vm14 = vcmp.eq.f32.partialorder %v895_v26, inf }
 0x185   :  { %534 = vst [vmem:[#allocation5 + $0x70] sm:$0xff] %v518_v42  ;;  %v481_v49 = vmul.f32 %v655_v57, %v480_v19  ;;  %v505_v63 = vmul.f32 %v661_v37, %v489_v47  ;;  %v406_v12 = vmul.f32 %v663_v61, %v405_v45  ;;  %672 = vrcp.f32 %v266_v54 }
 0x186   :  { %v400_v53 = vsel %vm399_vm10, %v888_v8, %v398_v48  ;;  %v324_v57 = vsub.f32 1.5, %v323_v51  ;;  %v667_v8 = vpop.eup %666  ;;  %674 = vrsqrt.f32 %v949_v46  ;;  %vm329_vm15 = vcmp.eq.f32.partialorder %v895_v26, 0.0 }
 0x187   :  { %v403_v10 = vsel %vm401_vm11, %v402_v7, %v400_v53  ;;  %v482_v58 = vmul.f32 %v481_v49, %v893_v25  ;;  %521 = vst [vmem:[#allocation5 + $0x8] sm:$0xff] %v505_v63  ;;  %v407_v62 = vmul.f32 0.5, %v406_v12  ;;  %v669_v7 = vpop.eup %668  ;;  %676 = vrcp.f32 %v273_v2 }
 0x188   :  { %v496_v59 = vmul.f32 %v403_v10, %v853_v30  ;;  %v325_v1 = vmul.f32 %v659_v9, %v324_v57  ;;  %v333_v23 = vmul.f32 %v669_v7, %v916_v56  ;;  %v267_v35 = vadd.f32 1.0, %v916_v56 }
 0x189   :  { %v484_v0 = vsel %vm483_vm12, %v893_v25, %v482_v58  ;;  %v408_v5 = vsub.f32 1.5, %v407_v62  ;;  %v330_v25 = vand.u32 2147483648, %v895_v26  ;;  %vm411_vm0 = vcmp.eq.f32.partialorder %v913_v52, inf }
 0x18a   :  { %v512_v3 = vmul.f32 %v665_v55, %v496_v59  ;;  %v487_v4 = vsel %vm485_vm13, %v486_v50, %v484_v0  ;;  %v970_v6 = vpop.f32.mrf.mxu2  ;;  %v326_v22 = vmul.f32 %v325_v1, %v895_v26  ;;  %v334_v36 = vmul.f32 %v669_v7, %v333_v23  ;;  %v671_v37 = vpop.eup %670 }
 0x18b   :  { %v503_v30 = vmul.f32 %v487_v4, %v835_v21  ;;  %v409_v9 = vmul.f32 %v663_v61, %v408_v5  ;;  %v978_v27 = vpop.f32.mrf.mxu1  ;;  %v414_v60 = vand.u32 2147483648, %v913_v52  ;;  %678 = vrsqrt.f32 %v970_v6  ;;  %v673_v32 = vpop.eup %672 }
 0x18c   :  { %528 = vst [vmem:[#allocation5 + $0x40] sm:$0xff] %v512_v3  ;;  %v328_v34 = vsel %vm327_vm14, %v895_v26, %v326_v22  ;;  %vm413_vm1 = vcmp.eq.f32.partialorder %v913_v52, 0.0  ;;  %v335_v39 = vmul.f32 0.5, %v334_v36  ;;  %v417_v40 = vmul.f32 %v671_v37, %v945_v28  ;;  %v675_v43 = vpop.eup %674 }
 0x18d   :  { %v519_v29 = vmul.f32 %v667_v8, %v503_v30  ;;  %v331_v21 = vsel %vm329_vm15, %v330_v25, %v328_v34  ;;  %v410_v33 = vmul.f32 %v409_v9, %v913_v52  ;;  %v274_v42 = vadd.f32 1.0, %v945_v28  ;;  %v677_v48 = vpop.eup %676 }
 0x18e   :  { %v490_v38 = vmul.f32 %v331_v21, %v821_v14  ;;  %680 = vrcp.f32 %v267_v35  ;;  %v336_v19 = vsub.f32 1.5, %v335_v39  ;;  %v418_v44 = vmul.f32 %v671_v37, %v417_v40 }
 0x18f   :  { %535 = vst [vmem:[#allocation5 + $0x78] sm:$0xff] %v519_v29  ;;  %v412_v26 = vsel %vm411_vm0, %v913_v52, %v410_v33  ;;  %vm339_vm2 = vcmp.eq.f32.partialorder %v916_v56, inf  ;;  %vm341_vm3 = vcmp.eq.f32.partialorder %v916_v56, 0.0  ;;  %v345_v52 = vmul.f32 %v675_v43, %v949_v46 }
 0x190   :  { %v506_v41 = vmul.f32 %v673_v32, %v490_v38  ;;  %v415_v61 = vsel %vm413_vm1, %v414_v60, %v412_v26  ;;  %682 = vrsqrt.f32 %v978_v27  ;;  %v337_v49 = vmul.f32 %v669_v7, %v336_v19 }
 0x191   :  { %v497_v14 = vmul.f32 %v415_v61, %v855_v31  ;;  %v342_v50 = vand.u32 2147483648, %v916_v56  ;;  %v419_v31 = vmul.f32 0.5, %v418_v44  ;;  %v679_v51 = vpop.eup %678  ;;  %684 = vrcp.f32 %v274_v42 }
 0x192   :  { %v993_v47 = vpop.f32.mrf.mxu2  ;;  %522 = vst [vmem:[#allocation5 + $0x10] sm:$0xff] %v506_v41  ;;  %vm423_vm4 = vcmp.eq.f32.partialorder %v945_v28, inf  ;;  %vm425_vm5 = vcmp.eq.f32.partialorder %v945_v28, 0.0  ;;  %v346_v63 = vmul.f32 %v675_v43, %v345_v52  ;;  %v338_v53 = vmul.f32 %v337_v49, %v916_v56 }
 0x193   :  { %v513_v45 = vmul.f32 %v677_v48, %v497_v14  ;;  %v420_v54 = vsub.f32 1.5, %v419_v31  ;;  %v429_v12 = vmul.f32 %v679_v51, %v970_v6  ;;  %686 = vrsqrt.f32 %v993_v47  ;;  %v1005_v55 = vpop.f32.mrf.mxu1 }
 0x194   :  { %v426_v10 = vand.u32 2147483648, %v945_v28  ;;  %v268_v58 = vadd.f32 1.0, %v949_v46  ;;  %v347_v57 = vmul.f32 0.5, %v346_v63  ;;  %vm351_vm6 = vcmp.eq.f32.partialorder %v949_v46, inf  ;;  %v681_v59 = vpop.eup %680 }
 0x195   :  { %529 = vst [vmem:[#allocation5 + $0x48] sm:$0xff] %v513_v45  ;;  %v340_v62 = vsel %vm339_vm2, %v916_v56, %v338_v53  ;;  %v421_v0 = vmul.f32 %v671_v37, %v420_v54  ;;  %vm353_vm7 = vcmp.eq.f32.partialorder %v949_v46, 0.0  ;;  %v430_v1 = vmul.f32 %v679_v51, %v429_v12 }
 0x196   :  { %v683_v2 = vpop.eup %682  ;;  %v343_v8 = vsel %vm341_vm3, %v342_v50, %v340_v62  ;;  %v348_v3 = vsub.f32 1.5, %v347_v57  ;;  %v275_v4 = vadd.f32 1.0, %v970_v6  ;;  %688 = vrsqrt.f32 %v1005_v55 }
 0x197   :  { %v491_v5 = vmul.f32 %v343_v8, %v825_v16  ;;  %v422_v7 = vmul.f32 %v421_v0, %v945_v28  ;;  %v431_v30 = vmul.f32 0.5, %v430_v1  ;;  %v357_v22 = vmul.f32 %v683_v2, %v978_v27  ;;  %v685_v25 = vpop.eup %684 }
 0x198   :  { %690 = vrcp.f32 %v268_v58  ;;  %v349_v9 = vmul.f32 %v675_v43, %v348_v3  ;;  %v354_v23 = vand.u32 2147483648, %v949_v46  ;;  %vm435_vm8 = vcmp.eq.f32.partialorder %v970_v6, inf }
 0x199   :  { %v687_v56 = vpop.eup %686  ;;  %v507_v29 = vmul.f32 %v681_v59, %v491_v5  ;;  %v424_v34 = vsel %vm423_vm4, %v945_v28, %v422_v7  ;;  %v432_v21 = vsub.f32 1.5, %v431_v30  ;;  %v358_v16 = vmul.f32 %v683_v2, %v357_v22 }
 0x19a   :  { %v1026_v33 = vpop.f32.mrf.mxu2  ;;  %v427_v35 = vsel %vm425_vm5, %v426_v10, %v424_v34  ;;  %v350_v36 = vmul.f32 %v349_v9, %v949_v46  ;;  %692 = vrcp.f32 %v275_v4  ;;  %v441_v37 = vmul.f32 %v687_v56, %v993_v47 }
 0x19b   :  { %523 = vst [vmem:[#allocation5 + $0x18] sm:$0xff] %v507_v29  ;;  %v498_v38 = vmul.f32 %v427_v35, %v815_v11  ;;  %v433_v60 = vmul.f32 %v679_v51, %v432_v21  ;;  %v269_v32 = vadd.f32 1.0, %v978_v27  ;;  %v359_v26 = vmul.f32 0.5, %v358_v16 }
 0x19c   :  { %v689_v39 = vpop.eup %688  ;;  %v352_v40 = vsel %vm351_vm6, %v949_v46, %v350_v36  ;;  %v438_v28 = vand.u32 2147483648, %v970_v6  ;;  %v442_v41 = vmul.f32 %v687_v56, %v441_v37  ;;  %694 = vrsqrt.f32 %v1026_v33 }
 0x19d   :  { %v514_v61 = vmul.f32 %v685_v25, %v498_v38  ;;  %v355_v42 = vsel %vm353_vm7, %v354_v23, %v352_v40  ;;  %v434_v11 = vmul.f32 %v433_v60, %v970_v6  ;;  %v360_v43 = vsub.f32 1.5, %v359_v26 }
 0x19e   :  { %v691_v14 = vpop.eup %690  ;;  %v492_v19 = vmul.f32 %v355_v42, %v829_v18  ;;  %v276_v44 = vadd.f32 1.0, %v993_v47  ;;  %v443_v48 = vmul.f32 0.5, %v442_v41  ;;  %v369_v52 = vmul.f32 %v689_v39, %v1005_v55 }
 0x19f   :  { %530 = vst [vmem:[#allocation5 + $0x50] sm:$0xff] %v514_v61  ;;  %v436_v45 = vsel %vm435_vm8, %v970_v6, %v434_v11  ;;  %vm437_vm9 = vcmp.eq.f32.partialorder %v970_v6, 0.0  ;;  %696 = vrcp.f32 %v269_v32  ;;  %v361_v46 = vmul.f32 %v683_v2, %v360_v43 }
 0x1a0   :  { %v693_v49 = vpop.eup %692  ;;  %v508_v50 = vmul.f32 %v691_v14, %v492_v19  ;;  %v439_v31 = vsel %vm437_vm9, %v438_v28, %v436_v45  ;;  %v444_v51 = vsub.f32 1.5, %v443_v48  ;;  %v370_v63 = vmul.f32 %v689_v39, %v369_v52 }
 0x1a1   :  { %v499_v18 = vmul.f32 %v439_v31, %v819_v13  ;;  %v362_v53 = vmul.f32 %v361_v46, %v978_v27  ;;  %vm363_vm10 = vcmp.eq.f32.partialorder %v978_v27, inf  ;;  %vm365_vm11 = vcmp.eq.f32.partialorder %v978_v27, 0.0 }
 0x1a2   :  { %v695_v54 = vpop.eup %694  ;;  %524 = vst [vmem:[#allocation5 + $0x20] sm:$0xff] %v508_v50  ;;  %v366_v12 = vand.u32 2147483648, %v978_v27  ;;  %698 = vrcp.f32 %v276_v44  ;;  %v445_v6 = vmul.f32 %v687_v56, %v444_v51  ;;  %v371_v10 = vmul.f32 0.5, %v370_v63 }
 0x1a3   :  { %v515_v58 = vmul.f32 %v693_v49, %v499_v18  ;;  %v364_v57 = vsel %vm363_vm10, %v978_v27, %v362_v53  ;;  %v270_v59 = vadd.f32 1.0, %v1005_v55  ;;  %v453_v13 = vmul.f32 %v695_v54, %v1026_v33 }
 0x1a4   :  { %v367_v62 = vsel %vm365_vm11, %v366_v12, %v364_v57  ;;  %v446_v0 = vmul.f32 %v445_v6, %v993_v47  ;;  %v372_v1 = vsub.f32 1.5, %v371_v10  ;;  %vm447_vm12 = vcmp.eq.f32.partialorder %v993_v47, inf }
 0x1a5   :  { %v697_v2 = vpop.eup %696  ;;  %531 = vst [vmem:[#allocation5 + $0x58] sm:$0xff] %v515_v58  ;;  %v493_v8 = vmul.f32 %v367_v62, %v833_v20  ;;  %v450_v3 = vand.u32 2147483648, %v993_v47  ;;  %v454_v4 = vmul.f32 %v695_v54, %v453_v13  ;;  %vm449_vm13 = vcmp.eq.f32.partialorder %v993_v47, 0.0 }
 0x1a6   :  { %v448_v5 = vsel %vm447_vm12, %v993_v47, %v446_v0  ;;  %v373_v27 = vmul.f32 %v689_v39, %v372_v1  ;;  %700 = vrcp.f32 %v270_v59  ;;  %v277_v20 = vadd.f32 1.0, %v1026_v33 }
 0x1a7   :  { %v509_v7 = vmul.f32 %v697_v2, %v493_v8  ;;  %v451_v30 = vsel %vm449_vm13, %v450_v3, %v448_v5  ;;  %v455_v22 = vmul.f32 0.5, %v454_v4  ;;  %vm375_vm14 = vcmp.eq.f32.partialorder %v1005_v55, inf }
 0x1a8   :  { %v699_v25 = vpop.eup %698  ;;  %v500_v9 = vmul.f32 %v451_v30, %v823_v15  ;;  %v374_v23 = vmul.f32 %v373_v27, %v1005_v55  ;;  %v378_v56 = vand.u32 2147483648, %v1005_v55  ;;  %vm377_vm15 = vcmp.eq.f32.partialorder %v1005_v55, 0.0 }
 0x1a9   :  { %525 = vst [vmem:[#allocation5 + $0x28] sm:$0xff] %v509_v7  ;;  %v456_v29 = vsub.f32 1.5, %v455_v22  ;;  %702 = vrcp.f32 %v277_v20  ;;  %vm459_vm0 = vcmp.eq.f32.partialorder %v1026_v33, inf  ;;  %v462_v38 = vand.u32 2147483648, %v1026_v33 }
 0x1aa   :  { %v516_v34 = vmul.f32 %v699_v25, %v500_v9  ;;  %v376_v47 = vsel %vm375_vm14, %v1005_v55, %v374_v23  ;;  %vm461_vm1 = vcmp.eq.f32.partialorder %v1026_v33, 0.0 }
 0x1ab   :  { %v379_v21 = vsel %vm377_vm15, %v378_v56, %v376_v47  ;;  %v457_v16 = vmul.f32 %v695_v54, %v456_v29 }
 0x1ac   :  { %532 = vst [vmem:[#allocation5 + $0x60] sm:$0xff] %v516_v34  ;;  %v494_v15 = vmul.f32 %v379_v21, %v841_v24  ;;  %v701_v35 = vpop.eup %700 }
 0x1ad   :  { %v458_v36 = vmul.f32 %v457_v16, %v1026_v33 }
 0x1ae   :  { %v510_v37 = vmul.f32 %v701_v35, %v494_v15 }
 0x1af   :  { %v460_v60 = vsel %vm459_vm0, %v1026_v33, %v458_v36  ;;  %v703_v32 = vpop.eup %702 }
 0x1b0   :  { %526 = vst [vmem:[#allocation5 + $0x30] sm:$0xff] %v510_v37  ;;  %v463_v55 = vsel %vm461_vm1, %v462_v38, %v460_v60 }
 0x1b1   :  { %v501_v24 = vmul.f32 %v463_v55, %v827_v17 }
 0x1b3   :  { %v517_v26 = vmul.f32 %v703_v32, %v501_v24 }
 0x1b5   :  { %533 = vst [vmem:[#allocation5 + $0x68] sm:$0xff] %v517_v26 }
 0x1b6   :  { %548 = dma.vmem_to_hbm [thread:$0]  %s541_s8, 2048, %s543_s11, [#allocation4], %s757_s17, %s757_s17, %s758_s18  }
 0x1b7   :  { %754 = dma.done.wait [#allocation4], 2048  }
 0x1b8   :  { %755 = vsyncadd [#allocation4], 4294965248 }
 0x1b9   :  { %553 = vsyncpa [#allocation3], 1 }
 0x1ba   :  { %554 = vsyncpa [#allocation4], 1 }

</bundles_post_ra>
